<compile_context>
chip_gen: v7x
topology: tpu7x:2x2x1
jax: 0.10.0
libtpu: 0.0.40
codegen_flags: <defaults>
</compile_context>

<pallas_src>
import math

import jax
import jax.numpy as jnp
from jax.experimental import pallas as pl
from jax.experimental.pallas import tpu as pltpu


def _round_up(v, m):
    return ((v + m - 1) // m) * m


def _gru_seq_kernel(h0_ref,      # VMEM (1, Hp)       initial hidden state (resident)
                    xproj_ref,   # VMEM (TT, 2*Hp)    pre-projected inputs (+bias), streamed
                    w_ref,       # VMEM (Hp, 2*Hp)    packed [W^T | alpha*|W^T|], resident
                    hseq_ref,    # VMEM (TT, Hp)      hidden state after each step (output tile)
                    h_carry):    # VMEM scratch (1, Hp)  h carried across grid steps
    Hp = h0_ref.shape[-1]
    TT = xproj_ref.shape[0]

    # Seed the carried hidden state on the very first grid step.
    @pl.when(pl.program_id(0) == 0)
    def _init():
        h_carry[...] = h0_ref[...]

    h = h_carry[...]                                              # (1, Hp)
    for i in range(TT):                                           # static unroll over the block
        # (1, Hp) @ (Hp, 2*Hp) on the MXU; x-half + biases already folded into xproj.
        pre = (jnp.dot(h, w_ref[...], preferred_element_type=jnp.float32)
               + xproj_ref[i:i + 1, :])
        cand = jax.nn.sigmoid(pre[:, :Hp])                        # candidate
        z = jax.nn.sigmoid(pre[:, Hp:])                           # update gate
        h = z * h + (1.0 - z) * cand
        hseq_ref[i:i + 1, :] = h                                  # fill one row of the dense tile

    h_carry[...] = h                                              # carry to the next grid step


@jax.jit
def simpler_gru_cell_scan(params, h0, x_seq):
    """Run T recurrent steps of simplerGRUCell with one fused Pallas kernel.

    params: dict with w (H,H), p (H,I), b_z (H,1), b (H,1),
            scalar_alpha (1,), scalar_beta (1,)
    h0:     (1, H)   initial hidden state (module's self.h_t convention)
    x_seq:  (T, I)   one input column vector per timestep (as rows)
    returns (T, H)   hidden state after each timestep
    """
    H = params["w"].shape[0]
    I = params["p"].shape[1]
    T = x_seq.shape[0]
    Hp = _round_up(max(H, 1), 128)
    Ip = _round_up(max(I, 1), 128)
    TT = 8                                        # timesteps per grid step (multiple of 8)
    Tp = _round_up(max(T, 1), TT)

    f32 = jnp.float32
    wT = params["w"].T.astype(f32)                                # (H, H)
    pT = params["p"].T.astype(f32)                                # (I, H)
    alpha = params["scalar_alpha"].astype(f32).reshape(())
    beta = params["scalar_beta"].astype(f32).reshape(())

    # Resident recurrent weight: [W^T | alpha*|W^T|], pre-scaled / pre-abs'd once.
    w_packed = jnp.zeros((Hp, 2 * Hp), f32)
    w_packed = w_packed.at[:H, :H].set(wT)
    w_packed = w_packed.at[:H, Hp:Hp + H].set(alpha * jnp.abs(wT))

    # Hoisted input projection over all T timesteps (one batched matmul), with the
    # packed bias folded in so the recurrent critical path has no bias add.
    p_packed = jnp.zeros((Ip, 2 * Hp), f32)
    p_packed = p_packed.at[:I, :H].set(pT)
    p_packed = p_packed.at[:I, Hp:Hp + H].set(beta * jnp.abs(pT))
    bias = jnp.zeros((1, 2 * Hp), f32)
    bias = bias.at[0, :H].set(params["b"].reshape(H).astype(f32))
    bias = bias.at[0, Hp:Hp + H].set(params["b_z"].reshape(H).astype(f32))
    x_pad = jnp.zeros((Tp, Ip), f32).at[:T, :I].set(x_seq.astype(f32))
    xproj = jnp.dot(x_pad, p_packed,
                    preferred_element_type=f32,
                    precision=jax.lax.Precision.HIGHEST) + bias    # (Tp, 2*Hp)

    h0_pad = jnp.zeros((1, Hp), f32).at[:, :H].set(h0.astype(f32))

    # VMEM budget: resident weight + double-buffered streamed/out blocks + headroom.
    bytes_needed = 4 * 2 * (Hp * 2 * Hp + TT * 2 * Hp + TT * Hp + 2 * Hp)
    vmem_limit = int(min(max(bytes_needed + (4 << 20), 16 << 20), 64 << 20))

    h_seq_pad = pl.pallas_call(
        _gru_seq_kernel,
        out_shape=jax.ShapeDtypeStruct((Tp, Hp), f32),
        grid_spec=pltpu.PrefetchScalarGridSpec(
            num_scalar_prefetch=0,
            grid=(Tp // TT,),
            in_specs=[
                pl.BlockSpec((1, Hp), lambda t: (0, 0)),           # h0 (resident)
                pl.BlockSpec((TT, 2 * Hp), lambda t: (t, 0)),      # xproj tile (streamed)
                pl.BlockSpec((Hp, 2 * Hp), lambda t: (0, 0)),      # packed W (resident)
            ],
            out_specs=pl.BlockSpec((TT, Hp), lambda t: (t, 0)),    # dense (TT, Hp) tile
            scratch_shapes=[pltpu.VMEM((1, Hp), jnp.float32)],     # carried hidden state
        ),
        compiler_params=pltpu.CompilerParams(
            dimension_semantics=("arbitrary",),                    # recurrent: in order
            vmem_limit_bytes=vmem_limit),
    )(h0_pad, xproj, w_packed)

    return h_seq_pad[:T, :H]                                       # (T, H)


def init_params(key, input_size, hidden_size):
    """Matches the module's __init__: every parameter ~ U(-1/sqrt(H), 1/sqrt(H))."""
    bound = 1.0 / math.sqrt(hidden_size)
    ks = jax.random.split(key, 6)
    u = lambda k, shape: jax.random.uniform(
        k, shape, dtype=jnp.float32, minval=-bound, maxval=bound)
    return {
        "b_z": u(ks[0], (hidden_size, 1)),
        "scalar_alpha": u(ks[1], (1,)),
        "scalar_beta": u(ks[2], (1,)),
        "w": u(ks[3], (hidden_size, hidden_size)),
        "p": u(ks[4], (hidden_size, input_size)),
        "b": u(ks[5], (hidden_size, 1)),
    }


def _reference_scan(params, h0, x_seq):
    """Pure-JAX reference mirroring the PyTorch forward (column-vector form)."""
    h = h0                                                 # (1, H)
    outs = []
    for t in range(x_seq.shape[0]):
        x_col = x_seq[t].reshape(-1, 1)                    # (I, 1)
        h_col = h.T                                        # (H, 1)
        z = jax.nn.sigmoid(params["scalar_alpha"] * (jnp.abs(params["w"]) @ h_col)
                           + params["scalar_beta"] * (jnp.abs(params["p"]) @ x_col)
                           + params["b_z"])
        cand = jax.nn.sigmoid(params["w"] @ h_col + params["p"] @ x_col + params["b"])
        h = (z * h_col + (1.0 - z) * cand).T               # (1, H)
        outs.append(h)
    return jnp.concatenate(outs, axis=0)                   # (T, H)


if __name__ == "__main__":
    input_size = 16
    hidden_size = 32
    seq_len = 8

    key = jax.random.PRNGKey(0)
    k_params, k_x = jax.random.split(key)

    params = init_params(k_params, input_size, hidden_size)
    x_seq = jax.random.normal(k_x, (seq_len, input_size), dtype=jnp.float32)
    h0 = jnp.zeros((1, hidden_size), dtype=jnp.float32)

    # fused Pallas kernel: all timesteps in one pallas_call (blocked over time)
    h_seq = simpler_gru_cell_scan(params, h0, x_seq)
    h_seq = jax.block_until_ready(h_seq)

    # silent correctness check against the pure-JAX reference
    h_seq_ref = _reference_scan(params, h0, x_seq)
    assert h_seq.shape == (seq_len, hidden_size)
    assert jnp.allclose(h_seq, h_seq_ref, atol=1e-4, rtol=1e-4)

    print("KERNEL_OK")
</pallas_src>

<mosaic_0001>
module attributes {stable_mosaic.version = 11 : i64} {
  func.func @_gru_seq_kernel(%arg0: i32, %arg1: memref<1x128xf32, #tpu.memory_space<vmem>>, %arg2: memref<8x256xf32, #tpu.memory_space<vmem>>, %arg3: memref<128x256xf32, #tpu.memory_space<vmem>>, %arg4: memref<8x128xf32, #tpu.memory_space<vmem>>, %arg5: memref<1x128xf32, #tpu.memory_space<vmem>>) attributes {dimension_semantics = [#tpu.dimension_semantics<arbitrary>], iteration_bounds = array<i64: 1>, scalar_prefetch = 0 : i64, scratch_operands = 1 : i64, tpu.core_type = #tpu.core_type<tc>, window_params = [{pipeline_mode = #tpu.pipeline_mode<synchronous>, transform_indices = @transform_0, window_bounds = array<i64: 1, 128>}, {transform_indices = @transform_1, window_bounds = array<i64: 8, 256>}, {pipeline_mode = #tpu.pipeline_mode<synchronous>, transform_indices = @transform_2, window_bounds = array<i64: 128, 256>}, {transform_indices = @transform_3, window_bounds = array<i64: 8, 128>}]} {
    %c0_i32 = arith.constant 0 : i32
    %0 = arith.cmpi eq, %arg0, %c0_i32 : i32
    %1 = arith.extui %0 : i1 to i32
    %c0_i32_0 = arith.constant 0 : i32
    %2 = arith.cmpi ne, %1, %c0_i32_0 : i32
    scf.if %2 {
      %c0_76 = arith.constant 0 : index
      %c0_77 = arith.constant 0 : index
      %181 = vector.load %arg1[%c0_76, %c0_77] : memref<1x128xf32, #tpu.memory_space<vmem>>, vector<1x128xf32>
      %c0_78 = arith.constant 0 : index
      %c0_79 = arith.constant 0 : index
      %182 = vector.load %arg5[%c0_78, %c0_79] : memref<1x128xf32, #tpu.memory_space<vmem>>, vector<1x128xf32>
      tpu.vector_store %arg5[%c0_78, %c0_79], %181 {strides = array<i32>} : memref<1x128xf32, #tpu.memory_space<vmem>>, vector<1x128xf32>,
    } else {
    }
    %c0 = arith.constant 0 : index
    %c0_1 = arith.constant 0 : index
    %3 = vector.load %arg5[%c0, %c0_1] : memref<1x128xf32, #tpu.memory_space<vmem>>, vector<1x128xf32>
    %c0_2 = arith.constant 0 : index
    %c0_3 = arith.constant 0 : index
    %4 = vector.load %arg3[%c0_2, %c0_3] : memref<128x256xf32, #tpu.memory_space<vmem>>, vector<128x256xf32>
    %cst = arith.constant dense<0.000000e+00> : vector<1x256xf32>
    %5 = tpu.matmul %3, %4, %cst {dimension_numbers = #tpu.dot_dimension_numbers<[1], [0], [0], [1], [0, 0, 1, 1], [], []>} : vector<1x128xf32>, vector<128x256xf32>, vector<1x256xf32> -> vector<1x256xf32>
    %c0_4 = arith.constant 0 : index
    %c0_5 = arith.constant 0 : index
    %6 = vector.load %arg2[%c0_4, %c0_5] : memref<8x256xf32, #tpu.memory_space<vmem>>, vector<1x256xf32>
    %7 = arith.addf %5, %6 : vector<1x256xf32>
    %8 = vector.extract_strided_slice %7 {offsets = [0, 0], sizes = [1, 128], strides = [1, 1]} : vector<1x256xf32> to vector<1x128xf32>
    %9 = arith.negf %8 : vector<1x128xf32>
    %10 = math.exp %9 : vector<1x128xf32>
    %cst_6 = arith.constant 1.000000e+00 : f32
    %11 = vector.broadcast %cst_6 : f32 to vector<1x128xf32>
    %12 = arith.addf %11, %10 : vector<1x128xf32>
    %13 = arith.divf %11, %12 : vector<1x128xf32>
    %14 = vector.extract_strided_slice %7 {offsets = [0, 128], sizes = [1, 128], strides = [1, 1]} : vector<1x256xf32> to vector<1x128xf32>
    %15 = arith.negf %14 : vector<1x128xf32>
    %16 = math.exp %15 : vector<1x128xf32>
    %cst_7 = arith.constant 1.000000e+00 : f32
    %17 = vector.broadcast %cst_7 : f32 to vector<1x128xf32>
    %18 = arith.addf %17, %16 : vector<1x128xf32>
    %19 = arith.divf %17, %18 : vector<1x128xf32>
    %20 = arith.mulf %19, %3 : vector<1x128xf32>
    %cst_8 = arith.constant 1.000000e+00 : f32
    %21 = vector.broadcast %cst_8 : f32 to vector<1x128xf32>
    %22 = arith.subf %21, %19 : vector<1x128xf32>
    %23 = arith.mulf %22, %13 : vector<1x128xf32>
    %24 = arith.addf %20, %23 : vector<1x128xf32>
    %c0_9 = arith.constant 0 : index
    %c0_10 = arith.constant 0 : index
    %25 = vector.load %arg4[%c0_9, %c0_10] : memref<8x128xf32, #tpu.memory_space<vmem>>, vector<1x128xf32>
    tpu.vector_store %arg4[%c0_9, %c0_10], %24 {strides = array<i32>} : memref<8x128xf32, #tpu.memory_space<vmem>>, vector<1x128xf32>,
    %c0_11 = arith.constant 0 : index
    %c0_12 = arith.constant 0 : index
    %26 = vector.load %arg3[%c0_11, %c0_12] : memref<128x256xf32, #tpu.memory_space<vmem>>, vector<128x256xf32>
    %cst_13 = arith.constant dense<0.000000e+00> : vector<1x256xf32>
    %27 = tpu.matmul %24, %26, %cst_13 {dimension_numbers = #tpu.dot_dimension_numbers<[1], [0], [0], [1], [0, 0, 1, 1], [], []>} : vector<1x128xf32>, vector<128x256xf32>, vector<1x256xf32> -> vector<1x256xf32>
    %c1 = arith.constant 1 : index
    %c0_14 = arith.constant 0 : index
    %28 = vector.load %arg2[%c1, %c0_14] : memref<8x256xf32, #tpu.memory_space<vmem>>, vector<1x256xf32>
    %29 = arith.addf %27, %28 : vector<1x256xf32>
    %30 = vector.extract_strided_slice %29 {offsets = [0, 0], sizes = [1, 128], strides = [1, 1]} : vector<1x256xf32> to vector<1x128xf32>
    %31 = arith.negf %30 : vector<1x128xf32>
    %32 = math.exp %31 : vector<1x128xf32>
    %cst_15 = arith.constant 1.000000e+00 : f32
    %33 = vector.broadcast %cst_15 : f32 to vector<1x128xf32>
    %34 = arith.addf %33, %32 : vector<1x128xf32>
    %35 = arith.divf %33, %34 : vector<1x128xf32>
    %36 = vector.extract_strided_slice %29 {offsets = [0, 128], sizes = [1, 128], strides = [1, 1]} : vector<1x256xf32> to vector<1x128xf32>
    %37 = arith.negf %36 : vector<1x128xf32>
    %38 = math.exp %37 : vector<1x128xf32>
    %cst_16 = arith.constant 1.000000e+00 : f32
    %39 = vector.broadcast %cst_16 : f32 to vector<1x128xf32>
    %40 = arith.addf %39, %38 : vector<1x128xf32>
    %41 = arith.divf %39, %40 : vector<1x128xf32>
    %42 = arith.mulf %41, %24 : vector<1x128xf32>
    %cst_17 = arith.constant 1.000000e+00 : f32
    %43 = vector.broadcast %cst_17 : f32 to vector<1x128xf32>
    %44 = arith.subf %43, %41 : vector<1x128xf32>
    %45 = arith.mulf %44, %35 : vector<1x128xf32>
    %46 = arith.addf %42, %45 : vector<1x128xf32>
    %c1_18 = arith.constant 1 : index
    %c0_19 = arith.constant 0 : index
    %47 = vector.load %arg4[%c1_18, %c0_19] : memref<8x128xf32, #tpu.memory_space<vmem>>, vector<1x128xf32>
    tpu.vector_store %arg4[%c1_18, %c0_19], %46 {strides = array<i32>} : memref<8x128xf32, #tpu.memory_space<vmem>>, vector<1x128xf32>,
    %c0_20 = arith.constant 0 : index
    %c0_21 = arith.constant 0 : index
    %48 = vector.load %arg3[%c0_20, %c0_21] : memref<128x256xf32, #tpu.memory_space<vmem>>, vector<128x256xf32>
    %cst_22 = arith.constant dense<0.000000e+00> : vector<1x256xf32>
    %49 = tpu.matmul %46, %48, %cst_22 {dimension_numbers = #tpu.dot_dimension_numbers<[1], [0], [0], [1], [0, 0, 1, 1], [], []>} : vector<1x128xf32>, vector<128x256xf32>, vector<1x256xf32> -> vector<1x256xf32>
    %c2 = arith.constant 2 : index
    %c0_23 = arith.constant 0 : index
    %50 = vector.load %arg2[%c2, %c0_23] : memref<8x256xf32, #tpu.memory_space<vmem>>, vector<1x256xf32>
    %51 = arith.addf %49, %50 : vector<1x256xf32>
    %52 = vector.extract_strided_slice %51 {offsets = [0, 0], sizes = [1, 128], strides = [1, 1]} : vector<1x256xf32> to vector<1x128xf32>
    %53 = arith.negf %52 : vector<1x128xf32>
    %54 = math.exp %53 : vector<1x128xf32>
    %cst_24 = arith.constant 1.000000e+00 : f32
    %55 = vector.broadcast %cst_24 : f32 to vector<1x128xf32>
    %56 = arith.addf %55, %54 : vector<1x128xf32>
    %57 = arith.divf %55, %56 : vector<1x128xf32>
    %58 = vector.extract_strided_slice %51 {offsets = [0, 128], sizes = [1, 128], strides = [1, 1]} : vector<1x256xf32> to vector<1x128xf32>
    %59 = arith.negf %58 : vector<1x128xf32>
    %60 = math.exp %59 : vector<1x128xf32>
    %cst_25 = arith.constant 1.000000e+00 : f32
    %61 = vector.broadcast %cst_25 : f32 to vector<1x128xf32>
    %62 = arith.addf %61, %60 : vector<1x128xf32>
    %63 = arith.divf %61, %62 : vector<1x128xf32>
    %64 = arith.mulf %63, %46 : vector<1x128xf32>
    %cst_26 = arith.constant 1.000000e+00 : f32
    %65 = vector.broadcast %cst_26 : f32 to vector<1x128xf32>
    %66 = arith.subf %65, %63 : vector<1x128xf32>
    %67 = arith.mulf %66, %57 : vector<1x128xf32>
    %68 = arith.addf %64, %67 : vector<1x128xf32>
    %c2_27 = arith.constant 2 : index
    %c0_28 = arith.constant 0 : index
    %69 = vector.load %arg4[%c2_27, %c0_28] : memref<8x128xf32, #tpu.memory_space<vmem>>, vector<1x128xf32>
    tpu.vector_store %arg4[%c2_27, %c0_28], %68 {strides = array<i32>} : memref<8x128xf32, #tpu.memory_space<vmem>>, vector<1x128xf32>,
    %c0_29 = arith.constant 0 : index
    %c0_30 = arith.constant 0 : index
    %70 = vector.load %arg3[%c0_29, %c0_30] : memref<128x256xf32, #tpu.memory_space<vmem>>, vector<128x256xf32>
    %cst_31 = arith.constant dense<0.000000e+00> : vector<1x256xf32>
    %71 = tpu.matmul %68, %70, %cst_31 {dimension_numbers = #tpu.dot_dimension_numbers<[1], [0], [0], [1], [0, 0, 1, 1], [], []>} : vector<1x128xf32>, vector<128x256xf32>, vector<1x256xf32> -> vector<1x256xf32>
    %c3 = arith.constant 3 : index
    %c0_32 = arith.constant 0 : index
    %72 = vector.load %arg2[%c3, %c0_32] : memref<8x256xf32, #tpu.memory_space<vmem>>, vector<1x256xf32>
    %73 = arith.addf %71, %72 : vector<1x256xf32>
    %74 = vector.extract_strided_slice %73 {offsets = [0, 0], sizes = [1, 128], strides = [1, 1]} : vector<1x256xf32> to vector<1x128xf32>
    %75 = arith.negf %74 : vector<1x128xf32>
    %76 = math.exp %75 : vector<1x128xf32>
    %cst_33 = arith.constant 1.000000e+00 : f32
    %77 = vector.broadcast %cst_33 : f32 to vector<1x128xf32>
    %78 = arith.addf %77, %76 : vector<1x128xf32>
    %79 = arith.divf %77, %78 : vector<1x128xf32>
    %80 = vector.extract_strided_slice %73 {offsets = [0, 128], sizes = [1, 128], strides = [1, 1]} : vector<1x256xf32> to vector<1x128xf32>
    %81 = arith.negf %80 : vector<1x128xf32>
    %82 = math.exp %81 : vector<1x128xf32>
    %cst_34 = arith.constant 1.000000e+00 : f32
    %83 = vector.broadcast %cst_34 : f32 to vector<1x128xf32>
    %84 = arith.addf %83, %82 : vector<1x128xf32>
    %85 = arith.divf %83, %84 : vector<1x128xf32>
    %86 = arith.mulf %85, %68 : vector<1x128xf32>
    %cst_35 = arith.constant 1.000000e+00 : f32
    %87 = vector.broadcast %cst_35 : f32 to vector<1x128xf32>
    %88 = arith.subf %87, %85 : vector<1x128xf32>
    %89 = arith.mulf %88, %79 : vector<1x128xf32>
    %90 = arith.addf %86, %89 : vector<1x128xf32>
    %c3_36 = arith.constant 3 : index
    %c0_37 = arith.constant 0 : index
    %91 = vector.load %arg4[%c3_36, %c0_37] : memref<8x128xf32, #tpu.memory_space<vmem>>, vector<1x128xf32>
    tpu.vector_store %arg4[%c3_36, %c0_37], %90 {strides = array<i32>} : memref<8x128xf32, #tpu.memory_space<vmem>>, vector<1x128xf32>,
    %c0_38 = arith.constant 0 : index
    %c0_39 = arith.constant 0 : index
    %92 = vector.load %arg3[%c0_38, %c0_39] : memref<128x256xf32, #tpu.memory_space<vmem>>, vector<128x256xf32>
    %cst_40 = arith.constant dense<0.000000e+00> : vector<1x256xf32>
    %93 = tpu.matmul %90, %92, %cst_40 {dimension_numbers = #tpu.dot_dimension_numbers<[1], [0], [0], [1], [0, 0, 1, 1], [], []>} : vector<1x128xf32>, vector<128x256xf32>, vector<1x256xf32> -> vector<1x256xf32>
    %c4 = arith.constant 4 : index
    %c0_41 = arith.constant 0 : index
    %94 = vector.load %arg2[%c4, %c0_41] : memref<8x256xf32, #tpu.memory_space<vmem>>, vector<1x256xf32>
    %95 = arith.addf %93, %94 : vector<1x256xf32>
    %96 = vector.extract_strided_slice %95 {offsets = [0, 0], sizes = [1, 128], strides = [1, 1]} : vector<1x256xf32> to vector<1x128xf32>
    %97 = arith.negf %96 : vector<1x128xf32>
    %98 = math.exp %97 : vector<1x128xf32>
    %cst_42 = arith.constant 1.000000e+00 : f32
    %99 = vector.broadcast %cst_42 : f32 to vector<1x128xf32>
    %100 = arith.addf %99, %98 : vector<1x128xf32>
    %101 = arith.divf %99, %100 : vector<1x128xf32>
    %102 = vector.extract_strided_slice %95 {offsets = [0, 128], sizes = [1, 128], strides = [1, 1]} : vector<1x256xf32> to vector<1x128xf32>
    %103 = arith.negf %102 : vector<1x128xf32>
    %104 = math.exp %103 : vector<1x128xf32>
    %cst_43 = arith.constant 1.000000e+00 : f32
    %105 = vector.broadcast %cst_43 : f32 to vector<1x128xf32>
    %106 = arith.addf %105, %104 : vector<1x128xf32>
    %107 = arith.divf %105, %106 : vector<1x128xf32>
    %108 = arith.mulf %107, %90 : vector<1x128xf32>
    %cst_44 = arith.constant 1.000000e+00 : f32
    %109 = vector.broadcast %cst_44 : f32 to vector<1x128xf32>
    %110 = arith.subf %109, %107 : vector<1x128xf32>
    %111 = arith.mulf %110, %101 : vector<1x128xf32>
    %112 = arith.addf %108, %111 : vector<1x128xf32>
    %c4_45 = arith.constant 4 : index
    %c0_46 = arith.constant 0 : index
    %113 = vector.load %arg4[%c4_45, %c0_46] : memref<8x128xf32, #tpu.memory_space<vmem>>, vector<1x128xf32>
    tpu.vector_store %arg4[%c4_45, %c0_46], %112 {strides = array<i32>} : memref<8x128xf32, #tpu.memory_space<vmem>>, vector<1x128xf32>,
    %c0_47 = arith.constant 0 : index
    %c0_48 = arith.constant 0 : index
    %114 = vector.load %arg3[%c0_47, %c0_48] : memref<128x256xf32, #tpu.memory_space<vmem>>, vector<128x256xf32>
    %cst_49 = arith.constant dense<0.000000e+00> : vector<1x256xf32>
    %115 = tpu.matmul %112, %114, %cst_49 {dimension_numbers = #tpu.dot_dimension_numbers<[1], [0], [0], [1], [0, 0, 1, 1], [], []>} : vector<1x128xf32>, vector<128x256xf32>, vector<1x256xf32> -> vector<1x256xf32>
    %c5 = arith.constant 5 : index
    %c0_50 = arith.constant 0 : index
    %116 = vector.load %arg2[%c5, %c0_50] : memref<8x256xf32, #tpu.memory_space<vmem>>, vector<1x256xf32>
    %117 = arith.addf %115, %116 : vector<1x256xf32>
    %118 = vector.extract_strided_slice %117 {offsets = [0, 0], sizes = [1, 128], strides = [1, 1]} : vector<1x256xf32> to vector<1x128xf32>
    %119 = arith.negf %118 : vector<1x128xf32>
    %120 = math.exp %119 : vector<1x128xf32>
    %cst_51 = arith.constant 1.000000e+00 : f32
    %121 = vector.broadcast %cst_51 : f32 to vector<1x128xf32>
    %122 = arith.addf %121, %120 : vector<1x128xf32>
    %123 = arith.divf %121, %122 : vector<1x128xf32>
    %124 = vector.extract_strided_slice %117 {offsets = [0, 128], sizes = [1, 128], strides = [1, 1]} : vector<1x256xf32> to vector<1x128xf32>
    %125 = arith.negf %124 : vector<1x128xf32>
    %126 = math.exp %125 : vector<1x128xf32>
    %cst_52 = arith.constant 1.000000e+00 : f32
    %127 = vector.broadcast %cst_52 : f32 to vector<1x128xf32>
    %128 = arith.addf %127, %126 : vector<1x128xf32>
    %129 = arith.divf %127, %128 : vector<1x128xf32>
    %130 = arith.mulf %129, %112 : vector<1x128xf32>
    %cst_53 = arith.constant 1.000000e+00 : f32
    %131 = vector.broadcast %cst_53 : f32 to vector<1x128xf32>
    %132 = arith.subf %131, %129 : vector<1x128xf32>
    %133 = arith.mulf %132, %123 : vector<1x128xf32>
    %134 = arith.addf %130, %133 : vector<1x128xf32>
    %c5_54 = arith.constant 5 : index
    %c0_55 = arith.constant 0 : index
    %135 = vector.load %arg4[%c5_54, %c0_55] : memref<8x128xf32, #tpu.memory_space<vmem>>, vector<1x128xf32>
    tpu.vector_store %arg4[%c5_54, %c0_55], %134 {strides = array<i32>} : memref<8x128xf32, #tpu.memory_space<vmem>>, vector<1x128xf32>,
    %c0_56 = arith.constant 0 : index
    %c0_57 = arith.constant 0 : index
    %136 = vector.load %arg3[%c0_56, %c0_57] : memref<128x256xf32, #tpu.memory_space<vmem>>, vector<128x256xf32>
    %cst_58 = arith.constant dense<0.000000e+00> : vector<1x256xf32>
    %137 = tpu.matmul %134, %136, %cst_58 {dimension_numbers = #tpu.dot_dimension_numbers<[1], [0], [0], [1], [0, 0, 1, 1], [], []>} : vector<1x128xf32>, vector<128x256xf32>, vector<1x256xf32> -> vector<1x256xf32>
    %c6 = arith.constant 6 : index
    %c0_59 = arith.constant 0 : index
    %138 = vector.load %arg2[%c6, %c0_59] : memref<8x256xf32, #tpu.memory_space<vmem>>, vector<1x256xf32>
    %139 = arith.addf %137, %138 : vector<1x256xf32>
    %140 = vector.extract_strided_slice %139 {offsets = [0, 0], sizes = [1, 128], strides = [1, 1]} : vector<1x256xf32> to vector<1x128xf32>
    %141 = arith.negf %140 : vector<1x128xf32>
    %142 = math.exp %141 : vector<1x128xf32>
    %cst_60 = arith.constant 1.000000e+00 : f32
    %143 = vector.broadcast %cst_60 : f32 to vector<1x128xf32>
    %144 = arith.addf %143, %142 : vector<1x128xf32>
    %145 = arith.divf %143, %144 : vector<1x128xf32>
    %146 = vector.extract_strided_slice %139 {offsets = [0, 128], sizes = [1, 128], strides = [1, 1]} : vector<1x256xf32> to vector<1x128xf32>
    %147 = arith.negf %146 : vector<1x128xf32>
    %148 = math.exp %147 : vector<1x128xf32>
    %cst_61 = arith.constant 1.000000e+00 : f32
    %149 = vector.broadcast %cst_61 : f32 to vector<1x128xf32>
    %150 = arith.addf %149, %148 : vector<1x128xf32>
    %151 = arith.divf %149, %150 : vector<1x128xf32>
    %152 = arith.mulf %151, %134 : vector<1x128xf32>
    %cst_62 = arith.constant 1.000000e+00 : f32
    %153 = vector.broadcast %cst_62 : f32 to vector<1x128xf32>
    %154 = arith.subf %153, %151 : vector<1x128xf32>
    %155 = arith.mulf %154, %145 : vector<1x128xf32>
    %156 = arith.addf %152, %155 : vector<1x128xf32>
    %c6_63 = arith.constant 6 : index
    %c0_64 = arith.constant 0 : index
    %157 = vector.load %arg4[%c6_63, %c0_64] : memref<8x128xf32, #tpu.memory_space<vmem>>, vector<1x128xf32>
    tpu.vector_store %arg4[%c6_63, %c0_64], %156 {strides = array<i32>} : memref<8x128xf32, #tpu.memory_space<vmem>>, vector<1x128xf32>,
    %c0_65 = arith.constant 0 : index
    %c0_66 = arith.constant 0 : index
    %158 = vector.load %arg3[%c0_65, %c0_66] : memref<128x256xf32, #tpu.memory_space<vmem>>, vector<128x256xf32>
    %cst_67 = arith.constant dense<0.000000e+00> : vector<1x256xf32>
    %159 = tpu.matmul %156, %158, %cst_67 {dimension_numbers = #tpu.dot_dimension_numbers<[1], [0], [0], [1], [0, 0, 1, 1], [], []>} : vector<1x128xf32>, vector<128x256xf32>, vector<1x256xf32> -> vector<1x256xf32>
    %c7 = arith.constant 7 : index
    %c0_68 = arith.constant 0 : index
    %160 = vector.load %arg2[%c7, %c0_68] : memref<8x256xf32, #tpu.memory_space<vmem>>, vector<1x256xf32>
    %161 = arith.addf %159, %160 : vector<1x256xf32>
    %162 = vector.extract_strided_slice %161 {offsets = [0, 0], sizes = [1, 128], strides = [1, 1]} : vector<1x256xf32> to vector<1x128xf32>
    %163 = arith.negf %162 : vector<1x128xf32>
    %164 = math.exp %163 : vector<1x128xf32>
    %cst_69 = arith.constant 1.000000e+00 : f32
    %165 = vector.broadcast %cst_69 : f32 to vector<1x128xf32>
    %166 = arith.addf %165, %164 : vector<1x128xf32>
    %167 = arith.divf %165, %166 : vector<1x128xf32>
    %168 = vector.extract_strided_slice %161 {offsets = [0, 128], sizes = [1, 128], strides = [1, 1]} : vector<1x256xf32> to vector<1x128xf32>
    %169 = arith.negf %168 : vector<1x128xf32>
    %170 = math.exp %169 : vector<1x128xf32>
    %cst_70 = arith.constant 1.000000e+00 : f32
    %171 = vector.broadcast %cst_70 : f32 to vector<1x128xf32>
    %172 = arith.addf %171, %170 : vector<1x128xf32>
    %173 = arith.divf %171, %172 : vector<1x128xf32>
    %174 = arith.mulf %173, %156 : vector<1x128xf32>
    %cst_71 = arith.constant 1.000000e+00 : f32
    %175 = vector.broadcast %cst_71 : f32 to vector<1x128xf32>
    %176 = arith.subf %175, %173 : vector<1x128xf32>
    %177 = arith.mulf %176, %167 : vector<1x128xf32>
    %178 = arith.addf %174, %177 : vector<1x128xf32>
    %c7_72 = arith.constant 7 : index
    %c0_73 = arith.constant 0 : index
    %179 = vector.load %arg4[%c7_72, %c0_73] : memref<8x128xf32, #tpu.memory_space<vmem>>, vector<1x128xf32>
    tpu.vector_store %arg4[%c7_72, %c0_73], %178 {strides = array<i32>} : memref<8x128xf32, #tpu.memory_space<vmem>>, vector<1x128xf32>,
    %c0_74 = arith.constant 0 : index
    %c0_75 = arith.constant 0 : index
    %180 = vector.load %arg5[%c0_74, %c0_75] : memref<1x128xf32, #tpu.memory_space<vmem>>, vector<1x128xf32>
    tpu.vector_store %arg5[%c0_74, %c0_75], %178 {strides = array<i32>} : memref<1x128xf32, #tpu.memory_space<vmem>>, vector<1x128xf32>,
    return
  }
  func.func @transform_0(%arg0: i32) -> (i32, i32) {
    %c0_i32 = arith.constant 0 : i32
    %c0_i32_0 = arith.constant 0 : i32
    %c0_i32_1 = arith.constant 0 : i32
    return %c0_i32, %c0_i32_0 : i32, i32
  }
  func.func @transform_1(%arg0: i32) -> (i32, i32) {
    %c0_i32 = arith.constant 0 : i32
    %c0_i32_0 = arith.constant 0 : i32
    return %arg0, %c0_i32 : i32, i32
  }
  func.func @transform_2(%arg0: i32) -> (i32, i32) {
    %c0_i32 = arith.constant 0 : i32
    %c0_i32_0 = arith.constant 0 : i32
    %c0_i32_1 = arith.constant 0 : i32
    return %c0_i32, %c0_i32_0 : i32, i32
  }
  func.func @transform_3(%arg0: i32) -> (i32, i32) {
    %c0_i32 = arith.constant 0 : i32
    %c0_i32_0 = arith.constant 0 : i32
    return %arg0, %c0_i32 : i32, i32
  }
}

</mosaic_0001>

<bundles_post_ra>
// kernel: simpler_gru_cell_scan.1
= control target key start
LH: loop header
LB: loop body
LE: loop exit
PB: predicated region body
PF: predicated region fallthrough
CT: control target
= control target key end

     0   :  { %v1469_v7 = vmov 0.0   ;;  %s1883_s0 = inlined_call_operand.vmem [shape: f32[1,128], index: 0, kind: input, shape index: {}]   ;;  %s1884_s1 = inlined_call_operand.vmem [shape: f32[8,256], index: 1, kind: input, shape index: {}]   ;;  %s1885_s2 = inlined_call_operand.vmem [shape: f32[128,256], index: 2, kind: input, shape index: {}]   ;;  %s1886_s3 = inlined_call_operand.hbm [shape: f32[8,128], index: 3, kind: output, shape index: {}]  }
   0x1   :  { %v23_v0 = vld [vmem:[%s1885_s2 + $0x8] sm:$0xff]  ;;  %v25_v1 = vld [vmem:[%s1885_s2 + $0x18] sm:$0xff]  ;;  %v22_v2 = vld [vmem:[%s1885_s2] sm:$0xff]  ;;  %130 = vmatprep.mubr.f32.mxu0 %v1469_v7  ;;  %263 = vmatprep.mubr.f32.mxu1 %v1469_v7 }
   0x2   :  { %v1500_v3 = vpack.c.bf16 %v25_v1, %v23_v0  ;;  %v24_v4 = vld [vmem:[%s1885_s2 + $0x10] sm:$0xff]  ;;  %v27_v5 = vld [vmem:[%s1885_s2 + $0x28] sm:$0xff]  ;;  %v29_v6 = vld [vmem:[%s1885_s2 + $0x38] sm:$0xff] }
   0x3   :  { %v1513_v8 = vpack.c.bf16 %v24_v4, %v22_v2  ;;  %v1515_v9 = vpack.c.bf16 %v29_v6, %v27_v5  ;;  %v26_v10 = vld [vmem:[%s1885_s2 + $0x20] sm:$0xff]  ;;  %v28_v11 = vld [vmem:[%s1885_s2 + $0x30] sm:$0xff]  ;;  %v31_v12 = vld [vmem:[%s1885_s2 + $0x48] sm:$0xff] }
   0x4   :  { %1124 = vmatprep.subr.bf16.mxu0 %v1500_v3  ;;  %v33_v13 = vld [vmem:[%s1885_s2 + $0x58] sm:$0xff]  ;;  %1156 = vmatprep.subr.bf16.mxu1 %v1500_v3  ;;  %v1532_v14 = vpack.c.bf16 %v28_v11, %v26_v10  ;;  %v30_v16 = vld [vmem:[%s1885_s2 + $0x40] sm:$0xff]  ;;  %v32_v17 = vld [vmem:[%s1885_s2 + $0x50] sm:$0xff] }
   0x5   :  { %1126 = vmatpush1.bf16.msra.mxu0 %v1513_v8  ;;  %1158 = vmatpush1.bf16.msra.mxu1 %v1513_v8  ;;  %v1536_v15 = vpack.c.bf16 %v33_v13, %v31_v12  ;;  %v35_v18 = vld [vmem:[%s1885_s2 + $0x68] sm:$0xff]  ;;  %v37_v19 = vld [vmem:[%s1885_s2 + $0x78] sm:$0xff]  ;;  %v1552_v20 = vpack.c.bf16 %v32_v17, %v30_v16  ;;  %v34_v22 = vld [vmem:[%s1885_s2 + $0x60] sm:$0xff] }
   0x6   :  { %1128 = vmatprep.subr.bf16.mxu0 %v1515_v9  ;;  %1160 = vmatprep.subr.bf16.mxu1 %v1515_v9  ;;  %v1556_v21 = vpack.c.bf16 %v37_v19, %v35_v18  ;;  %v36_v23 = vld [vmem:[%s1885_s2 + $0x70] sm:$0xff]  ;;  %v39_v24 = vld [vmem:[%s1885_s2 + $0x88] sm:$0xff]  ;;  %v41_v25 = vld [vmem:[%s1885_s2 + $0x98] sm:$0xff] }
   0x7   :  { %v19_v26 = vld [vmem:[%s1883_s0] sm:$0x1] }
   0x8   :  { %20 = vst [vmem:[#allocation2] sm:$0x1] %v19_v26 }
   0x9   :  { %1130 = vmatpush1.bf16.msra.mxu0 %v1532_v14  ;;  %1162 = vmatpush1.bf16.msra.mxu1 %v1532_v14 }
   0xa   :  { %1132 = vmatprep.subr.bf16.mxu0 %v1536_v15  ;;  %1164 = vmatprep.subr.bf16.mxu1 %v1536_v15 }
   0xb   :  { %8 = vsyncpa [#allocation4], 0  ;;  %v1575_v27 = vpack.c.bf16 %v36_v23, %v34_v22  ;;  %v1579_v28 = vpack.c.bf16 %v41_v25, %v39_v24  ;;  %v38_v29 = vld [vmem:[%s1885_s2 + $0x80] sm:$0xff]  ;;  %v40_v30 = vld [vmem:[%s1885_s2 + $0x90] sm:$0xff]  ;;  %v56_v51 = vlaneseq }
   0xc   :  { %v43_v31 = vld [vmem:[%s1885_s2 + $0xa8] sm:$0xff]  ;;  %v45_v32 = vld [vmem:[%s1885_s2 + $0xb8] sm:$0xff]  ;;  %v1595_v33 = vpack.c.bf16 %v40_v30, %v38_v29  ;;  %v42_v35 = vld [vmem:[%s1885_s2 + $0xa0] sm:$0xff] }
   0xd   :  { %1134 = vmatpush1.bf16.msra.mxu0 %v1552_v20  ;;  %1166 = vmatpush1.bf16.msra.mxu1 %v1552_v20  ;;  %v1599_v34 = vpack.c.bf16 %v45_v32, %v43_v31  ;;  %v44_v36 = vld [vmem:[%s1885_s2 + $0xb0] sm:$0xff]  ;;  %v47_v37 = vld [vmem:[%s1885_s2 + $0xc8] sm:$0xff]  ;;  %v49_v38 = vld [vmem:[%s1885_s2 + $0xd8] sm:$0xff]  ;;  %v57_v52 = vshrl.u32 %v56_v51, 7 }
   0xe   :  { %1136 = vmatprep.subr.bf16.mxu0 %v1556_v21  ;;  %1168 = vmatprep.subr.bf16.mxu1 %v1556_v21  ;;  %v1615_v39 = vpack.c.bf16 %v44_v36, %v42_v35  ;;  %v1619_v40 = vpack.c.bf16 %v49_v38, %v47_v37  ;;  %v46_v41 = vld [vmem:[%s1885_s2 + $0xc0] sm:$0xff]  ;;  %v48_v42 = vld [vmem:[%s1885_s2 + $0xd0] sm:$0xff]  ;;  %v51_v43 = vld [vmem:[%s1885_s2 + $0xe8] sm:$0xff] }
   0xf   :  { %v53_v44 = vld [vmem:[%s1885_s2 + $0xf8] sm:$0xff]  ;;  %v1635_v45 = vpack.c.bf16 %v48_v42, %v46_v41  ;;  %v50_v47 = vld [vmem:[%s1885_s2 + $0xe0] sm:$0xff]  ;;  %v52_v48 = vld [vmem:[%s1885_s2 + $0xf0] sm:$0xff]  ;;  %v1675_v53 = vsub.s32 0, %v57_v52  ;;  %v1680_v55 = vsub.s32 1, %v57_v52 }
  0x10   :  { %v1639_v46 = vpack.c.bf16 %v53_v44, %v51_v43  ;;  %v1649_v49 = vpack.c.bf16 %v52_v48, %v50_v47  ;;  %v21_v50 = vld [vmem:[#allocation2] sm:$0x1]  ;;  %v1102_v16 = vld [vmem:[%s1884_s1 + $0x1] ss:$8 sm:$0x3] }
  0x11   :  { %1138 = vmatpush1.bf16.msra.mxu0 %v1575_v27  ;;  %1170 = vmatpush1.bf16.msra.mxu1 %v1575_v27  ;;  %v54_v54 = vld [vmem:[%s1884_s1] ss:$8 sm:$0x3]  ;;  %v192_v17 = vrot.slane %v1102_v16, %v1675_v53  ;;  %v196_v18 = vrot.slane %v1102_v16, %v1680_v55  ;;  %v1105_v42 = vld [vmem:[%s1884_s1 + $0x2] ss:$8 sm:$0x3] }
  0x12   :  { %1140 = vmatprep.subr.bf16.mxu0 %v1579_v28  ;;  %1172 = vmatprep.subr.bf16.mxu1 %v1579_v28  ;;  %v59_v56 = vrot.slane %v54_v54, %v1675_v53  ;;  %v63_v57 = vrot.slane %v54_v54, %v1680_v55  ;;  %v325_v43 = vrot.slane %v1105_v42, %v1675_v53 }
  0x13   :  { %v329_v44 = vrot.slane %v1105_v42, %v1680_v55  ;;  %v821_v42 = vld [vmem:[%s1885_s2 + $0x10] sm:$0xff] }
  0x15   :  { %1142 = vmatpush1.bf16.msra.mxu0 %v1595_v33  ;;  %1174 = vmatpush1.bf16.msra.mxu1 %v1595_v33 }
  0x16   :  { %1144 = vmatprep.subr.bf16.mxu0 %v1599_v34  ;;  %1176 = vmatprep.subr.bf16.mxu1 %v1599_v34 }
  0x19   :  { %1146 = vmatpush1.bf16.msra.mxu0 %v1615_v39  ;;  %1178 = vmatpush1.bf16.msra.mxu1 %v1615_v39 }
  0x1a   :  { %1148 = vmatprep.subr.bf16.mxu0 %v1619_v40  ;;  %1180 = vmatprep.subr.bf16.mxu1 %v1619_v40 }
  0x1d   :  { %1150 = vmatpush1.bf16.msra.mxu0 %v1635_v45  ;;  %1182 = vmatpush1.bf16.msra.mxu1 %v1635_v45 }
  0x1e   :  { %1152 = vmatprep.subr.bf16.mxu0 %v1639_v46  ;;  %1184 = vmatprep.subr.bf16.mxu1 %v1639_v46 }
  0x21   :  { %1154 = vmatpush1.bf16.msra.mxu0 %v1649_v49  ;;  %1186 = vmatpush1.bf16.msra.mxu1 %v1649_v49 }
  0x22   :  { %1188 = vmatprep.subr.bf16.mxu0 %v1500_v3  ;;  %1220 = vmatprep.subr.bf16.mxu1 %v1500_v3 }
  0x24   :  { %131 = vmatmul.mubr.f32.vlgmr.msra.gmra.mrb[0].mxu0 %v21_v50 }
  0x25   :  { %1190 = vmatpush1.bf16.msra.mxu0 %v1513_v8  ;;  %396 = vmatprep.mubr.f32.mxu0 %v1469_v7 }
  0x26   :  { %1192 = vmatprep.subr.bf16.mxu0 %v1515_v9 }
  0x29   :  { %1194 = vmatpush1.bf16.msra.mxu0 %v1532_v14 }
  0x2a   :  { %1196 = vmatprep.subr.bf16.mxu0 %v1536_v15 }
  0x2d   :  { %1198 = vmatpush1.bf16.msra.mxu0 %v1552_v20 }
  0x2e   :  { %1200 = vmatprep.subr.bf16.mxu0 %v1556_v21 }
  0x31   :  { %1202 = vmatpush1.bf16.msra.mxu0 %v1575_v27 }
  0x32   :  { %1204 = vmatprep.subr.bf16.mxu0 %v1579_v28 }
  0x35   :  { %1206 = vmatpush1.bf16.msra.mxu0 %v1595_v33 }
  0x36   :  { %1208 = vmatprep.subr.bf16.mxu0 %v1599_v34 }
  0x39   :  { %1210 = vmatpush1.bf16.msra.mxu0 %v1615_v39 }
  0x3a   :  { %1212 = vmatprep.subr.bf16.mxu0 %v1619_v40 }
  0x3d   :  { %1214 = vmatpush1.bf16.msra.mxu0 %v1635_v45 }
  0x3e   :  { %1216 = vmatprep.subr.bf16.mxu0 %v1639_v46 }
  0x41   :  { %1218 = vmatpush1.bf16.msra.mxu0 %v1649_v49 }
  0x42   :  { %1252 = vmatprep.subr.bf16.mxu0 %v1500_v3 }
  0xf7   :  { %v132_v58 = vpop.f32.mrb[0].mxu0 }
  0xf8   :  { %v133_v59 = vadd.f32 %v132_v58, %v59_v56  ;;  %v134_v60 = vpop.f32.mrb[1].mxu0 }
  0xf9   :  { %v135_v61 = vadd.f32 %v134_v60, %v63_v57 }
  0xfa   :  { %v1100_v62 = vmul.f32 -1.442695, %v133_v59 }
  0xfb   :  { %v1101_v63 = vmul.f32 -1.442695, %v135_v61 }
  0xfc   :  { %1381 = vpow2.f32 %v1100_v62 }
  0xfd   :  { %1383 = vpow2.f32 %v1101_v63 }
 0x106   :  { %v1382_v0 = vpop.eup %1381 }
 0x107   :  { %v1384_v1 = vpop.eup %1383  ;;  %v140_v2 = vadd.f32 1.0, %v1382_v0 }
 0x108   :  { %v146_v4 = vadd.f32 1.0, %v1384_v1 }
 0x10a   :  { %1385 = vrcp.f32 %v146_v4 }
 0x10b   :  { %1387 = vrcp.f32 %v140_v2 }
 0x114   :  { %v1386_v5 = vpop.eup %1385 }
 0x115   :  { %v150_v6 = vsub.f32 1.0, %v1386_v5  ;;  %v1388_v10 = vpop.eup %1387  ;;  %v149_v11 = vmul.f32 %v1386_v5, %v21_v50 }
 0x117   :  { %v151_v12 = vmul.f32 %v1388_v10, %v150_v6  ;;  %v1111_v10 = vld [vmem:[%s1884_s1 + $0x4] ss:$8 sm:$0x3] }
 0x119   :  { %v152_v13 = vadd.f32 %v151_v12, %v149_v11  ;;  %v591_v11 = vrot.slane %v1111_v10, %v1675_v53  ;;  %v595_v12 = vrot.slane %v1111_v10, %v1680_v55 }
 0x11b   :  { %153 = vst [vmem:[#allocation3] sm:$0x1] %v152_v13  ;;  %264 = vmatmul.mubr.f32.vlgmr.msra.gmra.mrb[0].mxu1 %v152_v13 }
 0x11c   :  { %1222 = vmatpush1.bf16.msra.mxu1 %v1513_v8  ;;  %529 = vmatprep.mubr.f32.mxu1 %v1469_v7 }
 0x11d   :  { %1224 = vmatprep.subr.bf16.mxu1 %v1515_v9 }
 0x120   :  { %1226 = vmatpush1.bf16.msra.mxu1 %v1532_v14 }
 0x121   :  { %1228 = vmatprep.subr.bf16.mxu1 %v1536_v15 }
 0x124   :  { %1230 = vmatpush1.bf16.msra.mxu1 %v1552_v20 }
 0x125   :  { %1232 = vmatprep.subr.bf16.mxu1 %v1556_v21 }
 0x128   :  { %1234 = vmatpush1.bf16.msra.mxu1 %v1575_v27 }
 0x129   :  { %1236 = vmatprep.subr.bf16.mxu1 %v1579_v28 }
 0x12c   :  { %1238 = vmatpush1.bf16.msra.mxu1 %v1595_v33 }
 0x12d   :  { %1240 = vmatprep.subr.bf16.mxu1 %v1599_v34 }
 0x130   :  { %1242 = vmatpush1.bf16.msra.mxu1 %v1615_v39 }
 0x131   :  { %1244 = vmatprep.subr.bf16.mxu1 %v1619_v40 }
 0x134   :  { %1246 = vmatpush1.bf16.msra.mxu1 %v1635_v45 }
 0x135   :  { %1248 = vmatprep.subr.bf16.mxu1 %v1639_v46 }
 0x138   :  { %1250 = vmatpush1.bf16.msra.mxu1 %v1649_v49 }
 0x139   :  { %1284 = vmatprep.subr.bf16.mxu1 %v1500_v3 }
 0x1ee   :  { %v265_v19 = vpop.f32.mrb[0].mxu1 }
 0x1ef   :  { %v266_v22 = vadd.f32 %v265_v19, %v192_v17  ;;  %v267_v23 = vpop.f32.mrb[1].mxu1 }
 0x1f0   :  { %v268_v24 = vadd.f32 %v267_v23, %v196_v18 }
 0x1f1   :  { %v1103_v25 = vmul.f32 -1.442695, %v266_v22 }
 0x1f2   :  { %v1104_v26 = vmul.f32 -1.442695, %v268_v24 }
 0x1f3   :  { %1389 = vpow2.f32 %v1103_v25 }
 0x1f4   :  { %1391 = vpow2.f32 %v1104_v26 }
 0x1fd   :  { %v1390_v29 = vpop.eup %1389 }
 0x1fe   :  { %v1392_v30 = vpop.eup %1391  ;;  %v273_v31 = vadd.f32 1.0, %v1390_v29 }
 0x1ff   :  { %v279_v3 = vadd.f32 1.0, %v1392_v30 }
 0x201   :  { %1393 = vrcp.f32 %v279_v3 }
 0x202   :  { %1395 = vrcp.f32 %v273_v31 }
 0x20b   :  { %v1394_v32 = vpop.eup %1393 }
 0x20c   :  { %v283_v35 = vsub.f32 1.0, %v1394_v32  ;;  %v1396_v36 = vpop.eup %1395  ;;  %v282_v37 = vmul.f32 %v1394_v32, %v152_v13 }
 0x20e   :  { %v284_v38 = vmul.f32 %v1396_v36, %v283_v35  ;;  %v820_v36 = vld [vmem:[%s1885_s2 + $0x8] sm:$0xff] }
 0x210   :  { %v285_v41 = vadd.f32 %v284_v38, %v282_v37  ;;  %v822_v37 = vld [vmem:[%s1885_s2 + $0x18] sm:$0xff] }
 0x211   :  { %v1315_v38 = vpack.c.bf16 %v822_v37, %v820_v36 }
 0x212   :  { %286 = vst [vmem:[#allocation3 + $0x1] sm:$0x1] %v285_v41  ;;  %397 = vmatmul.mubr.f32.vlgmr.msra.gmra.mrb[2].mxu0 %v285_v41 }
 0x213   :  { %1254 = vmatpush1.bf16.msra.mxu0 %v1513_v8  ;;  %662 = vmatprep.mubr.f32.mxu0 %v1469_v7 }
 0x214   :  { %1256 = vmatprep.subr.bf16.mxu0 %v1515_v9 }
 0x217   :  { %1258 = vmatpush1.bf16.msra.mxu0 %v1532_v14 }
 0x218   :  { %1260 = vmatprep.subr.bf16.mxu0 %v1536_v15 }
 0x21b   :  { %1262 = vmatpush1.bf16.msra.mxu0 %v1552_v20 }
 0x21c   :  { %1264 = vmatprep.subr.bf16.mxu0 %v1556_v21 }
 0x21f   :  { %1266 = vmatpush1.bf16.msra.mxu0 %v1575_v27 }
 0x220   :  { %1268 = vmatprep.subr.bf16.mxu0 %v1579_v28 }
 0x223   :  { %1270 = vmatpush1.bf16.msra.mxu0 %v1595_v33 }
 0x224   :  { %1272 = vmatprep.subr.bf16.mxu0 %v1599_v34 }
 0x227   :  { %1274 = vmatpush1.bf16.msra.mxu0 %v1615_v39 }
 0x228   :  { %1276 = vmatprep.subr.bf16.mxu0 %v1619_v40 }
 0x22b   :  { %1278 = vmatpush1.bf16.msra.mxu0 %v1635_v45 }
 0x22c   :  { %1280 = vmatprep.subr.bf16.mxu0 %v1639_v46 }
 0x22f   :  { %1282 = vmatpush1.bf16.msra.mxu0 %v1649_v49 }
 0x230   :  { %1316 = vmatprep.subr.bf16.mxu0 %v1315_v38 }
 0x2e5   :  { %v398_v47 = vpop.f32.mrb[2].mxu0 }
 0x2e6   :  { %v399_v48 = vadd.f32 %v398_v47, %v325_v43  ;;  %v400_v50 = vpop.f32.mrb[3].mxu0 }
 0x2e7   :  { %v401_v51 = vadd.f32 %v400_v50, %v329_v44  ;;  %v826_v44 = vld [vmem:[%s1885_s2 + $0x38] sm:$0xff]  ;;  %v825_v50 = vld [vmem:[%s1885_s2 + $0x30] sm:$0xff] }
 0x2e8   :  { %v1106_v52 = vmul.f32 -1.442695, %v399_v48  ;;  %v823_v48 = vld [vmem:[%s1885_s2 + $0x20] sm:$0xff] }
 0x2e9   :  { %v1107_v54 = vmul.f32 -1.442695, %v401_v51  ;;  %v1321_v51 = vpack.c.bf16 %v825_v50, %v823_v48 }
 0x2ea   :  { %1397 = vpow2.f32 %v1106_v52  ;;  %v828_v52 = vld [vmem:[%s1885_s2 + $0x48] sm:$0xff] }
 0x2eb   :  { %1399 = vpow2.f32 %v1107_v54  ;;  %v830_v54 = vld [vmem:[%s1885_s2 + $0x58] sm:$0xff] }
 0x2f4   :  { %v1398_v56 = vpop.eup %1397 }
 0x2f5   :  { %v1400_v57 = vpop.eup %1399  ;;  %v406_v58 = vadd.f32 1.0, %v1398_v56  ;;  %v1323_v56 = vpack.c.bf16 %v830_v54, %v828_v52 }
 0x2f6   :  { %v412_v59 = vadd.f32 1.0, %v1400_v57  ;;  %v827_v57 = vld [vmem:[%s1885_s2 + $0x40] sm:$0xff] }
 0x2f8   :  { %1401 = vrcp.f32 %v412_v59 }
 0x2f9   :  { %1403 = vrcp.f32 %v406_v58  ;;  %v829_v58 = vld [vmem:[%s1885_s2 + $0x50] sm:$0xff] }
 0x2fa   :  { %v1325_v59 = vpack.c.bf16 %v829_v58, %v827_v57 }
 0x302   :  { %v1402_v60 = vpop.eup %1401 }
 0x303   :  { %v416_v61 = vsub.f32 1.0, %v1402_v60  ;;  %v1404_v62 = vpop.eup %1403  ;;  %v415_v63 = vmul.f32 %v1402_v60, %v285_v41  ;;  %v819_v41 = vld [vmem:[%s1885_s2] sm:$0xff]  ;;  %v832_v60 = vld [vmem:[%s1885_s2 + $0x68] sm:$0xff] }
 0x304   :  { %v1317_v43 = vpack.c.bf16 %v821_v42, %v819_v41 }
 0x305   :  { %v417_v0 = vmul.f32 %v1404_v62, %v416_v61  ;;  %v834_v61 = vld [vmem:[%s1885_s2 + $0x78] sm:$0xff] }
 0x306   :  { %v1327_v62 = vpack.c.bf16 %v834_v61, %v832_v60 }
 0x307   :  { %v418_v1 = vadd.f32 %v417_v0, %v415_v63  ;;  %v831_v63 = vld [vmem:[%s1885_s2 + $0x60] sm:$0xff]  ;;  %v833_v0 = vld [vmem:[%s1885_s2 + $0x70] sm:$0xff] }
 0x309   :  { %419 = vst [vmem:[#allocation3 + $0x2] sm:$0x1] %v418_v1  ;;  %530 = vmatmul.mubr.f32.vlgmr.msra.gmra.mrb[2].mxu1 %v418_v1 }
 0x30a   :  { %1286 = vmatpush1.bf16.msra.mxu1 %v1513_v8  ;;  %795 = vmatprep.mubr.f32.mxu1 %v1469_v7  ;;  %v1108_v8 = vld [vmem:[%s1884_s1 + $0x3] ss:$8 sm:$0x3] }
 0x30b   :  { %1288 = vmatprep.subr.bf16.mxu1 %v1515_v9  ;;  %v458_v9 = vrot.slane %v1108_v8, %v1675_v53 }
 0x30e   :  { %1290 = vmatpush1.bf16.msra.mxu1 %v1532_v14  ;;  %v462_v14 = vrot.slane %v1108_v8, %v1680_v55  ;;  %v836_v8 = vld [vmem:[%s1885_s2 + $0x88] sm:$0xff] }
 0x30f   :  { %1292 = vmatprep.subr.bf16.mxu1 %v1536_v15 }
 0x312   :  { %1294 = vmatpush1.bf16.msra.mxu1 %v1552_v20 }
 0x313   :  { %1296 = vmatprep.subr.bf16.mxu1 %v1556_v21 }
 0x316   :  { %1298 = vmatpush1.bf16.msra.mxu1 %v1575_v27 }
 0x317   :  { %1300 = vmatprep.subr.bf16.mxu1 %v1579_v28 }
 0x31a   :  { %1302 = vmatpush1.bf16.msra.mxu1 %v1595_v33 }
 0x31b   :  { %1304 = vmatprep.subr.bf16.mxu1 %v1599_v34 }
 0x31e   :  { %1306 = vmatpush1.bf16.msra.mxu1 %v1615_v39 }
 0x31f   :  { %1308 = vmatprep.subr.bf16.mxu1 %v1619_v40 }
 0x322   :  { %1310 = vmatpush1.bf16.msra.mxu1 %v1635_v45 }
 0x323   :  { %1312 = vmatprep.subr.bf16.mxu1 %v1639_v46 }
 0x326   :  { %1314 = vmatpush1.bf16.msra.mxu1 %v1649_v49 }
 0x327   :  { %1348 = vmatprep.subr.bf16.mxu1 %v1315_v38 }
 0x3dc   :  { %v531_v15 = vpop.f32.mrb[2].mxu1 }
 0x3dd   :  { %v532_v20 = vadd.f32 %v531_v15, %v458_v9  ;;  %v533_v21 = vpop.f32.mrb[3].mxu1  ;;  %v838_v9 = vld [vmem:[%s1885_s2 + $0x98] sm:$0xff]  ;;  %v835_v15 = vld [vmem:[%s1885_s2 + $0x80] sm:$0xff] }
 0x3de   :  { %v534_v27 = vadd.f32 %v533_v21, %v462_v14  ;;  %v1331_v14 = vpack.c.bf16 %v838_v9, %v836_v8  ;;  %v1120_v8 = vld [vmem:[%s1884_s1 + $0x7] ss:$8 sm:$0x3] }
 0x3df   :  { %v1109_v28 = vmul.f32 -1.442695, %v532_v20  ;;  %v837_v20 = vld [vmem:[%s1885_s2 + $0x90] sm:$0xff]  ;;  %v990_v9 = vrot.slane %v1120_v8, %v1675_v53 }
 0x3e0   :  { %v1110_v33 = vmul.f32 -1.442695, %v534_v27  ;;  %v1333_v21 = vpack.c.bf16 %v837_v20, %v835_v15  ;;  %v840_v27 = vld [vmem:[%s1885_s2 + $0xa8] sm:$0xff] }
 0x3e1   :  { %1405 = vpow2.f32 %v1109_v28  ;;  %v842_v28 = vld [vmem:[%s1885_s2 + $0xb8] sm:$0xff] }
 0x3e2   :  { %1407 = vpow2.f32 %v1110_v33  ;;  %v839_v33 = vld [vmem:[%s1885_s2 + $0xa0] sm:$0xff] }
 0x3eb   :  { %v1406_v34 = vpop.eup %1405 }
 0x3ec   :  { %v1408_v39 = vpop.eup %1407  ;;  %v539_v40 = vadd.f32 1.0, %v1406_v34  ;;  %v1335_v34 = vpack.c.bf16 %v842_v28, %v840_v27 }
 0x3ed   :  { %v545_v45 = vadd.f32 1.0, %v1408_v39  ;;  %v841_v39 = vld [vmem:[%s1885_s2 + $0xb0] sm:$0xff] }
 0x3ef   :  { %1409 = vrcp.f32 %v545_v45  ;;  %v846_v45 = vld [vmem:[%s1885_s2 + $0xd8] sm:$0xff] }
 0x3f0   :  { %1411 = vrcp.f32 %v539_v40  ;;  %v844_v40 = vld [vmem:[%s1885_s2 + $0xc8] sm:$0xff] }
 0x3f9   :  { %v1410_v46 = vpop.eup %1409 }
 0x3fa   :  { %v549_v49 = vsub.f32 1.0, %v1410_v46  ;;  %v1412_v2 = vpop.eup %1411  ;;  %v548_v4 = vmul.f32 %v1410_v46, %v418_v1  ;;  %v1329_v1 = vpack.c.bf16 %v833_v0, %v831_v63  ;;  %v1337_v46 = vpack.c.bf16 %v841_v39, %v839_v33 }
 0x3fc   :  { %v550_v5 = vmul.f32 %v1412_v2, %v549_v49  ;;  %v1339_v49 = vpack.c.bf16 %v846_v45, %v844_v40  ;;  %v843_v2 = vld [vmem:[%s1885_s2 + $0xc0] sm:$0xff] }
 0x3fe   :  { %v551_v6 = vadd.f32 %v550_v5, %v548_v4  ;;  %v845_v4 = vld [vmem:[%s1885_s2 + $0xd0] sm:$0xff]  ;;  %v848_v5 = vld [vmem:[%s1885_s2 + $0xe8] sm:$0xff] }
 0x3ff   :  { %v1341_v10 = vpack.c.bf16 %v845_v4, %v843_v2 }
 0x400   :  { %552 = vst [vmem:[#allocation3 + $0x3] sm:$0x1] %v551_v6  ;;  %663 = vmatmul.mubr.f32.vlgmr.msra.gmra.mrb[4].mxu0 %v551_v6 }
 0x401   :  { %928 = vmatprep.mubr.f32.mxu0 %v1469_v7  ;;  %1318 = vmatpush1.bf16.msra.mxu0 %v1317_v43 }
 0x4d3   :  { %v664_v13 = vpop.f32.mrb[4].mxu0 }
 0x4d4   :  { %v665_v16 = vadd.f32 %v664_v13, %v591_v11  ;;  %v666_v17 = vpop.f32.mrb[5].mxu0  ;;  %v849_v13 = vld [vmem:[%s1885_s2 + $0xf0] sm:$0xff] }
 0x4d5   :  { %v667_v18 = vadd.f32 %v666_v17, %v595_v12  ;;  %v847_v12 = vld [vmem:[%s1885_s2 + $0xe0] sm:$0xff] }
 0x4d6   :  { %v1112_v19 = vmul.f32 -1.442695, %v665_v16  ;;  %v1345_v16 = vpack.c.bf16 %v849_v13, %v847_v12  ;;  %v1114_v17 = vld [vmem:[%s1884_s1 + $0x5] ss:$8 sm:$0x3] }
 0x4d7   :  { %v1113_v22 = vmul.f32 -1.442695, %v667_v18  ;;  %v724_v18 = vrot.slane %v1114_v17, %v1675_v53 }
 0x4d8   :  { %1413 = vpow2.f32 %v1112_v19  ;;  %v728_v19 = vrot.slane %v1114_v17, %v1680_v55 }
 0x4d9   :  { %1415 = vpow2.f32 %v1113_v22 }
 0x4e2   :  { %v1414_v23 = vpop.eup %1413 }
 0x4e3   :  { %v1416_v24 = vpop.eup %1415  ;;  %v672_v25 = vadd.f32 1.0, %v1414_v23 }
 0x4e4   :  { %v678_v26 = vadd.f32 1.0, %v1416_v24 }
 0x4e6   :  { %1417 = vrcp.f32 %v678_v26 }
 0x4e7   :  { %1419 = vrcp.f32 %v672_v25 }
 0x4f0   :  { %v1418_v29 = vpop.eup %1417 }
 0x4f1   :  { %v682_v30 = vsub.f32 1.0, %v1418_v29  ;;  %v1420_v31 = vpop.eup %1419  ;;  %v681_v3 = vmul.f32 %v1418_v29, %v551_v6  ;;  %v850_v6 = vld [vmem:[%s1885_s2 + $0xf8] sm:$0xff] }
 0x4f2   :  { %v1343_v11 = vpack.c.bf16 %v850_v6, %v848_v5 }
 0x4f3   :  { %v683_v32 = vmul.f32 %v1420_v31, %v682_v30 }
 0x4f5   :  { %v1754_v35 = vadd.f32 %v683_v32, %v681_v3 }
 0x4f7   :  { %685 = vst [vmem:[#allocation3 + $0x4] sm:$0x1] %v1754_v35  ;;  %796 = vmatmul.mubr.f32.vlgmr.msra.gmra.mrb[4].mxu1 %v1754_v35 }
 0x4f8   :  { %1061 = vmatprep.mubr.f32.mxu1 %v1469_v7  ;;  %v824_v7 = vld [vmem:[%s1885_s2 + $0x28] sm:$0xff]  ;;  %1350 = vmatpush1.bf16.msra.mxu1 %v1317_v43 }
 0x4f9   :  { %v1319_v47 = vpack.c.bf16 %v826_v44, %v824_v7  ;;  %v1117_v7 = vld [vmem:[%s1884_s1 + $0x6] ss:$8 sm:$0x3]  ;;  %s1470_s1 = smov [#allocation3]  }
 0x4fa   :  { %v857_v44 = vrot.slane %v1117_v7, %v1675_v53  ;;  %s1092_s18 = sshll.u32 %s1470_s1, 4  ;;  %s1093_s18 = int_to_ptr.vmem [resolvable:$true] %s1092_s18 }
 0x4fb   :  { %1320 = vmatprep.subr.bf16.mxu0 %v1319_v47  ;;  %1352 = vmatprep.subr.bf16.mxu1 %v1319_v47  ;;  %v861_v47 = vrot.slane %v1117_v7, %v1680_v55  ;;  %s1445_s19 = scalar_lea.vmem %s1093_s18, 128  ;;  %p1450_p1 = scmp.lt.s32.totalorder %s1093_s18, %s1093_s18 }
 0x4fc   :  { %1322 = vmatpush1.bf16.msra.mxu0 %v1321_v51  ;;  %1354 = vmatpush1.bf16.msra.mxu1 %v1321_v51  ;;  %p1446_p0 = scmp.ne.s32.totalorder %s1093_s18, %s1445_s19  ;;  %p1451_p2 = scmp.lt.s32.totalorder %s1445_s19, %s1445_s19 }
 0x4fd   :  { %1324 = vmatprep.subr.bf16.mxu0 %v1323_v56  ;;  %1356 = vmatprep.subr.bf16.mxu1 %v1323_v56 }
 0x4fe   :  { %p1452_p3 = por %p1451_p2, %p1450_p1 }
 0x500   :  { %1326 = vmatpush1.bf16.msra.mxu0 %v1325_v59  ;;  %1358 = vmatpush1.bf16.msra.mxu1 %v1325_v59  ;;  %p1453_p4 = pnand %p1452_p3, %p1446_p0 }
 0x501   :  { %1328 = vmatprep.subr.bf16.mxu0 %v1327_v62  ;;  %1360 = vmatprep.subr.bf16.mxu1 %v1327_v62 }
 0x504   :  { %1330 = vmatpush1.bf16.msra.mxu0 %v1329_v1  ;;  %1362 = vmatpush1.bf16.msra.mxu1 %v1329_v1 }
 0x505   :  { %1332 = vmatprep.subr.bf16.mxu0 %v1331_v14  ;;  %1364 = vmatprep.subr.bf16.mxu1 %v1331_v14  ;;  %v994_v14 = vrot.slane %v1120_v8, %v1680_v55 }
 0x508   :  { %1334 = vmatpush1.bf16.msra.mxu0 %v1333_v21  ;;  %1366 = vmatpush1.bf16.msra.mxu1 %v1333_v21 }
 0x509   :  { %1336 = vmatprep.subr.bf16.mxu0 %v1335_v34  ;;  %1368 = vmatprep.subr.bf16.mxu1 %v1335_v34 }
 0x50c   :  { %1338 = vmatpush1.bf16.msra.mxu0 %v1337_v46  ;;  %1370 = vmatpush1.bf16.msra.mxu1 %v1337_v46 }
 0x50d   :  { %1340 = vmatprep.subr.bf16.mxu0 %v1339_v49  ;;  %1372 = vmatprep.subr.bf16.mxu1 %v1339_v49 }
 0x510   :  { %1342 = vmatpush1.bf16.msra.mxu0 %v1341_v10  ;;  %1374 = vmatpush1.bf16.msra.mxu1 %v1341_v10 }
 0x511   :  { %1344 = vmatprep.subr.bf16.mxu0 %v1343_v11  ;;  %1376 = vmatprep.subr.bf16.mxu1 %v1343_v11 }
 0x514   :  { %1346 = vmatpush1.bf16.msra.mxu0 %v1345_v16  ;;  %1378 = vmatpush1.bf16.msra.mxu1 %v1345_v16 }
 0x5ca   :  { %v797_v22 = vpop.f32.mrb[4].mxu1 }
 0x5cb   :  { %v798_v23 = vadd.f32 %v797_v22, %v724_v18  ;;  %v799_v24 = vpop.f32.mrb[5].mxu1 }
 0x5cc   :  { %v800_v25 = vadd.f32 %v799_v24, %v728_v19 }
 0x5cd   :  { %v1115_v26 = vmul.f32 -1.442695, %v798_v23 }
 0x5ce   :  { %v1116_v29 = vmul.f32 -1.442695, %v800_v25 }
 0x5cf   :  { %1421 = vpow2.f32 %v1115_v26 }
 0x5d0   :  { %1423 = vpow2.f32 %v1116_v29 }
 0x5d9   :  { %v1422_v30 = vpop.eup %1421 }
 0x5da   :  { %v1424_v31 = vpop.eup %1423  ;;  %v805_v3 = vadd.f32 1.0, %v1422_v30 }
 0x5db   :  { %v811_v32 = vadd.f32 1.0, %v1424_v31 }
 0x5dd   :  { %1425 = vrcp.f32 %v811_v32 }
 0x5de   :  { %1427 = vrcp.f32 %v805_v3 }
 0x5e7   :  { %v1426_v36 = vpop.eup %1425 }
 0x5e8   :  { %v815_v37 = vsub.f32 1.0, %v1426_v36  ;;  %v1428_v38 = vpop.eup %1427  ;;  %v814_v41 = vmul.f32 %v1426_v36, %v1754_v35 }
 0x5ea   :  { %v816_v42 = vmul.f32 %v1428_v38, %v815_v37 }
 0x5ec   :  { %v817_v43 = vadd.f32 %v816_v42, %v814_v41 }
 0x5ee   :  { %818 = vst [vmem:[#allocation3 + $0x5] sm:$0x1] %v817_v43  ;;  %929 = vmatmul.mubr.f32.vlgmr.msra.gmra.mrb[6].mxu0 %v817_v43 }
 0x6c1   :  { %v930_v48 = vpop.f32.mrb[6].mxu0 }
 0x6c2   :  { %v931_v50 = vadd.f32 %v930_v48, %v857_v44  ;;  %v932_v51 = vpop.f32.mrb[7].mxu0 }
 0x6c3   :  { %v933_v52 = vadd.f32 %v932_v51, %v861_v47 }
 0x6c4   :  { %v1118_v54 = vmul.f32 -1.442695, %v931_v50 }
 0x6c5   :  { %v1119_v56 = vmul.f32 -1.442695, %v933_v52 }
 0x6c6   :  { %1429 = vpow2.f32 %v1118_v54 }
 0x6c7   :  { %1431 = vpow2.f32 %v1119_v56 }
 0x6d0   :  { %v1430_v35 = vpop.eup %1429 }
 0x6d1   :  { %v1432_v57 = vpop.eup %1431  ;;  %v938_v58 = vadd.f32 1.0, %v1430_v35 }
 0x6d2   :  { %v944_v59 = vadd.f32 1.0, %v1432_v57 }
 0x6d4   :  { %1433 = vrcp.f32 %v944_v59 }
 0x6d5   :  { %1435 = vrcp.f32 %v938_v58 }
 0x6de   :  { %v1434_v60 = vpop.eup %1433 }
 0x6df   :  { %v948_v61 = vsub.f32 1.0, %v1434_v60  ;;  %v1436_v62 = vpop.eup %1435  ;;  %v947_v63 = vmul.f32 %v1434_v60, %v817_v43 }
 0x6e1   :  { %v949_v0 = vmul.f32 %v1436_v62, %v948_v61 }
 0x6e3   :  { %v950_v1 = vadd.f32 %v949_v0, %v947_v63 }
 0x6e5   :  { %951 = vst [vmem:[#allocation3 + $0x6] sm:$0x1] %v950_v1  ;;  %1062 = vmatmul.mubr.f32.vlgmr.msra.gmra.mrb[6].mxu1 %v950_v1 }
 0x7b8   :  { %v1063_v15 = vpop.f32.mrb[6].mxu1 }
 0x7b9   :  { %v1064_v20 = vadd.f32 %v1063_v15, %v990_v9  ;;  %v1065_v21 = vpop.f32.mrb[7].mxu1 }
 0x7ba   :  { %v1066_v27 = vadd.f32 %v1065_v21, %v994_v14 }
 0x7bb   :  { %v1121_v28 = vmul.f32 -1.442695, %v1064_v20 }
 0x7bc   :  { %v1122_v33 = vmul.f32 -1.442695, %v1066_v27 }
 0x7bd   :  { %1437 = vpow2.f32 %v1121_v28 }
 0x7be   :  { %1439 = vpow2.f32 %v1122_v33 }
 0x7c7   :  { %v1438_v34 = vpop.eup %1437 }
 0x7c8   :  { %v1440_v39 = vpop.eup %1439  ;;  %v1071_v40 = vadd.f32 1.0, %v1438_v34 }
 0x7c9   :  { %v1077_v45 = vadd.f32 1.0, %v1440_v39 }
 0x7cb   :  { %1441 = vrcp.f32 %v1077_v45 }
 0x7cc   :  { %1443 = vrcp.f32 %v1071_v40 }
 0x7d5   :  { %v1442_v46 = vpop.eup %1441 }
 0x7d6   :  { %v1081_v49 = vsub.f32 1.0, %v1442_v46  ;;  %v1444_v2 = vpop.eup %1443  ;;  %v1080_v53 = vmul.f32 %v1442_v46, %v950_v1 }
 0x7d8   :  { %v1082_v55 = vmul.f32 %v1444_v2, %v1081_v49 }
 0x7da   :  { %v1083_v4 = vadd.f32 %v1082_v55, %v1080_v53 }
 0x7dc   :  { %1084 = vst [vmem:[#allocation3 + $0x7] sm:$0x1] %v1083_v4  ;;  %1085 = vst [vmem:[#allocation2] sm:$0x1] %v1083_v4 }
 0x7dd   :  { %1456 = shalt.err (!%p1453_p4)
}
 0x7de   :  { %s1457_s22 = scalar_lea.hbm %s1886_s3, 128 }
 0x7df   :  { %p1458_p5 = scmp.ne.s32.totalorder %s1886_s3, %s1457_s22  ;;  %p1461_p6 = scmp.lt.u32.totalorder %s1457_s22, %s1886_s3 }
 0x7e1   :  { %p1463_p7 = pnand %p1461_p6, %p1458_p5 }
 0x7e3   :  { %1466 = shalt.err (!%p1463_p7)
}
 0x7e4   :  { %1095 = dma.vmem_to_hbm [thread:$0]  %s1093_s18, 128, %s1886_s3, [#allocation4]  }
 0x7e5   :  { %1467 = dma.done.wait [#allocation4], 128  }
 0x7e6   :  { %1468 = vsyncadd [#allocation4], 4294967168 }
 0x7e7   :  { %1099 = vsyncpa [#allocation4], 1 }

</bundles_post_ra>
